<compile_context>
chip_gen: v5e
topology: v5e:2x2
jax: 0.10.0
libtpu: 0.0.40
codegen_flags: <defaults>
</compile_context>

<pallas_src>
import jax
import jax.numpy as jnp
from jax.experimental import pallas as pl
from jax.experimental.pallas import tpu as pltpu

C_IN = 128
C_OUT = 64
NEG_SLOPE = 0.6850005
LANE = 128


def conv1x1_leakyrelu_kernel(x_ref, w_ref, b_ref, o_ref):
    # x_ref: (C_IN, tp), w_ref: (C_OUT, C_IN), b_ref: (C_OUT, 1), o_ref: (C_OUT, tp)
    v1 = jnp.dot(w_ref[...], x_ref[...], preferred_element_type=jnp.float32)
    v1 = v1 + b_ref[...]
    # torch.where(v1 > 0, v1, v1 * negative_slope)
    o_ref[...] = jnp.where(v1 > 0, v1, v1 * NEG_SLOPE).astype(o_ref.dtype)


def _pick_pixel_tile(P, N, max_tile=8192, min_grid_steps=8):
    """Pick a lane-aligned pixel tile.

    Returns (tp, Pp):
      tp : pixel tile, a multiple of 128 (never larger than P when P >= 128)
      Pp : pixel extent of the kernel buffers (== P unless P < 128, in which
           case the pixel axis is padded up to one lane width).
    """
    if P < LANE:
        # Tiny pixel count: pad to one lane so output stores are unmasked.
        return LANE, LANE
    tp = min((max_tile // LANE) * LANE, (P // LANE) * LANE)
    tp = max(tp, LANE)
    # Keep enough grid steps to feed 2 TensorCores (v7x) + the DMA pipeline.
    while tp > LANE and N * pl.cdiv(P, tp) < min_grid_steps:
        tp = max(LANE, ((tp // 2) // LANE) * LANE)
    return tp, P


def conv1x1_leakyrelu(x_nchw, weight, bias, *, max_pixel_tile=8192):
    """x_nchw: (N, 128, H, W) f32; weight: (64, 128, 1, 1); bias: (64,)."""
    N, C, H, W = x_nchw.shape
    assert C == C_IN
    P = H * W
    tp, Pp = _pick_pixel_tile(P, N, max_pixel_tile)

    # Free reshape (contiguous): NCHW -> (N, C_IN, P). Channels on sublanes,
    # pixels on lanes — matches the input layout and gives lane-dense outputs.
    x3d = x_nchw.reshape(N, C_IN, P)
    if Pp != P:
        # Only taken when P < 128: negligible pad on a tiny pixel axis.
        x3d = jnp.pad(x3d, ((0, 0), (0, 0), (0, Pp - P)))

    w2d = weight.reshape(C_OUT, C_IN)          # (64, 128), resident in VMEM
    b2d = bias.reshape(C_OUT, 1)               # (64, 1)

    grid_p = pl.cdiv(Pp, tp)
    itemsize = jnp.dtype(x_nchw.dtype).itemsize
    # Gridded (padded) pixel extent, honest about what actually moves/computes.
    pix_gridded = grid_p * tp
    cost = pl.CostEstimate(
        flops=2 * N * pix_gridded * C_IN * C_OUT,
        transcendentals=0,
        bytes_accessed=N * pix_gridded * (C_IN + C_OUT) * itemsize
        + (C_IN * C_OUT + C_OUT) * 4,
    )

    out3d = pl.pallas_call(
        conv1x1_leakyrelu_kernel,
        out_shape=jax.ShapeDtypeStruct((N, C_OUT, Pp), x_nchw.dtype),
        grid_spec=pltpu.PrefetchScalarGridSpec(
            num_scalar_prefetch=0,
            grid=(N, grid_p),
            in_specs=[
                # leading batch dim squeezed out of the kernel view
                pl.BlockSpec((None, C_IN, tp), lambda n, j: (n, 0, j)),
                pl.BlockSpec((C_OUT, C_IN), lambda n, j: (0, 0)),
                pl.BlockSpec((C_OUT, 1), lambda n, j: (0, 0)),
            ],
            out_specs=pl.BlockSpec((None, C_OUT, tp), lambda n, j: (n, 0, j)),
        ),
        compiler_params=pltpu.CompilerParams(
            dimension_semantics=("parallel", "parallel"),
            # 48 MiB: safe on v5e/v6e (128 MiB physical) and v7x (64 MiB),
            # plenty for a 8192-pixel tile double-buffered (~12 MiB).
            vmem_limit_bytes=48 * 1024 * 1024,
        ),
        cost_estimate=cost,
    )(x3d, w2d, b2d)

    if Pp != P:
        out3d = out3d[:, :, :P]
    # Free reshape back to NCHW.
    return out3d.reshape(N, C_OUT, H, W)


def reference(x_nchw, weight, bias):
    # pure-JAX reference for sanity check
    w2d = weight.reshape(C_OUT, C_IN)
    v1 = jnp.einsum('nchw,oc->nohw', x_nchw, w2d) + bias[None, :, None, None]
    return jnp.where(v1 > 0, v1, v1 * NEG_SLOPE)


if __name__ == "__main__":
    key = jax.random.PRNGKey(0)
    kx, kw, kb = jax.random.split(key, 3)

    # deterministic parameter init (synthetic, PyTorch-default-like scale)
    bound = 1.0 / (C_IN ** 0.5)
    weight = jax.random.uniform(kw, (C_OUT, C_IN, 1, 1), jnp.float32, -bound, bound)
    bias = jax.random.uniform(kb, (C_OUT,), jnp.float32, -bound, bound)

    # primary small shape consistent with Conv2d(128, 64, 1): N=2, H=W=8 (P=64,
    # exercises the tiny-P lane-padding path)
    N, H, W = 2, 8, 8
    x = jax.random.normal(kx, (N, C_IN, H, W), dtype=jnp.float32)
    out = jax.block_until_ready(conv1x1_leakyrelu(x, weight, bias))
    ref = reference(x, weight, bias)
    assert out.shape == (N, C_OUT, H, W)
    assert jnp.allclose(out, ref, atol=1e-4, rtol=1e-4)

    # extra checks: exact-tiling path (P multiple of 128) and the
    # partial-boundary-block path (P >= 128, not a multiple of 128)
    for (n2, h2, w2) in [(1, 16, 16), (1, 16, 13)]:
        x2 = jax.random.normal(jax.random.PRNGKey(1), (n2, C_IN, h2, w2),
                               dtype=jnp.float32)
        o2 = jax.block_until_ready(conv1x1_leakyrelu(x2, weight, bias))
        r2 = reference(x2, weight, bias)
        assert o2.shape == (n2, C_OUT, h2, w2)
        assert jnp.allclose(o2, r2, atol=1e-4, rtol=1e-4)

    print("KERNEL_OK")
</pallas_src>

<mosaic_0001>
module attributes {stable_mosaic.version = 11 : i64} {
  func.func @conv1x1_leakyrelu_kernel(%arg0: i32, %arg1: i32, %arg2: memref<1x128x128xf32, #tpu.memory_space<vmem>>, %arg3: memref<64x128xf32, #tpu.memory_space<vmem>>, %arg4: memref<64x1xf32, #tpu.memory_space<vmem>>, %arg5: memref<1x64x128xf32, #tpu.memory_space<vmem>>) attributes {dimension_semantics = [#tpu.dimension_semantics<parallel>, #tpu.dimension_semantics<parallel>], iteration_bounds = array<i64: 2, 1>, scalar_prefetch = 0 : i64, scratch_operands = 0 : i64, tpu.core_type = #tpu.core_type<tc>, window_params = [{transform_indices = @transform_0, window_bounds = array<i64: 1, 128, 128>}, {pipeline_mode = #tpu.pipeline_mode<synchronous>, transform_indices = @transform_1, window_bounds = array<i64: 64, 128>}, {pipeline_mode = #tpu.pipeline_mode<synchronous>, transform_indices = @transform_2, window_bounds = array<i64: 64, 1>}, {transform_indices = @transform_3, window_bounds = array<i64: 1, 64, 128>}]} {
    %c0 = arith.constant 0 : index
    %c0_0 = arith.constant 0 : index
    %0 = vector.load %arg3[%c0, %c0_0] : memref<64x128xf32, #tpu.memory_space<vmem>>, vector<64x128xf32>
    %c0_1 = arith.constant 0 : index
    %c0_2 = arith.constant 0 : index
    %c0_3 = arith.constant 0 : index
    %1 = vector.load %arg2[%c0_1, %c0_2, %c0_3] : memref<1x128x128xf32, #tpu.memory_space<vmem>>, vector<1x128x128xf32>
    %2 = vector.shape_cast %1 : vector<1x128x128xf32> to vector<128x128xf32>
    %cst = arith.constant dense<0.000000e+00> : vector<64x128xf32>
    %3 = tpu.matmul %0, %2, %cst {dimension_numbers = #tpu.dot_dimension_numbers<[1], [0], [0], [1], [0, 0, 1, 1], [], []>} : vector<64x128xf32>, vector<128x128xf32>, vector<64x128xf32> -> vector<64x128xf32>
    %c0_4 = arith.constant 0 : index
    %c0_5 = arith.constant 0 : index
    %4 = vector.load %arg4[%c0_4, %c0_5] : memref<64x1xf32, #tpu.memory_space<vmem>>, vector<64x1xf32>
    %5 = vector.broadcast %4 : vector<64x1xf32> to vector<64x128xf32>
    %6 = arith.addf %3, %5 : vector<64x128xf32>
    %cst_6 = arith.constant 0.000000e+00 : f32
    %7 = vector.broadcast %cst_6 : f32 to vector<64x128xf32>
    %8 = arith.cmpf ogt, %6, %7 : vector<64x128xf32>
    %cst_7 = arith.constant 0.685000479 : f32
    %9 = vector.broadcast %cst_7 : f32 to vector<64x128xf32>
    %10 = arith.mulf %6, %9 : vector<64x128xf32>
    %11 = arith.select %8, %6, %10 : vector<64x128xi1>, vector<64x128xf32>
    %c0_8 = arith.constant 0 : index
    %c0_9 = arith.constant 0 : index
    %c0_10 = arith.constant 0 : index
    %12 = vector.load %arg5[%c0_8, %c0_9, %c0_10] : memref<1x64x128xf32, #tpu.memory_space<vmem>>, vector<1x64x128xf32>
    %13 = vector.shape_cast %12 : vector<1x64x128xf32> to vector<64x128xf32>
    %14 = vector.shape_cast %11 : vector<64x128xf32> to vector<1x64x128xf32>
    tpu.vector_store %arg5[%c0_8, %c0_9, %c0_10], %14 {strides = array<i32>} : memref<1x64x128xf32, #tpu.memory_space<vmem>>, vector<1x64x128xf32>,
    return
  }
  func.func @transform_0(%arg0: i32, %arg1: i32) -> (i32, i32, i32) {
    %c0_i32 = arith.constant 0 : i32
    %c0_i32_0 = arith.constant 0 : i32
    return %arg0, %c0_i32, %arg1 : i32, i32, i32
  }
  func.func @transform_1(%arg0: i32, %arg1: i32) -> (i32, i32) {
    %c0_i32 = arith.constant 0 : i32
    %c0_i32_0 = arith.constant 0 : i32
    %c0_i32_1 = arith.constant 0 : i32
    return %c0_i32, %c0_i32_0 : i32, i32
  }
  func.func @transform_2(%arg0: i32, %arg1: i32) -> (i32, i32) {
    %c0_i32 = arith.constant 0 : i32
    %c0_i32_0 = arith.constant 0 : i32
    %c0_i32_1 = arith.constant 0 : i32
    return %c0_i32, %c0_i32_0 : i32, i32
  }
  func.func @transform_3(%arg0: i32, %arg1: i32) -> (i32, i32, i32) {
    %c0_i32 = arith.constant 0 : i32
    %c0_i32_0 = arith.constant 0 : i32
    return %arg0, %c0_i32, %arg1 : i32, i32, i32
  }
}

</mosaic_0001>

<bundles_post_ra>
// kernel: tpu_custom_call.1
= control target key start
LH: loop header
LB: loop body
LE: loop exit
PB: predicated region body
PF: predicated region fallthrough
CT: control target
= control target key end

     0   :  { %8 = vsyncpa [#allocation3], 0  ;;  %s930_s0 = inlined_call_operand.hbm [shape: f32[2,128,128], index: 0, kind: input, shape index: {}]   ;;  %s931_s1 = inlined_call_operand.vmem [shape: f32[64,128], index: 1, kind: input, shape index: {}]   ;;  %s932_s2 = inlined_call_operand.vmem [shape: f32[64,1], index: 2, kind: input, shape index: {}]   ;;  %s933_s3 = inlined_call_operand.hbm [shape: f32[2,64,128], index: 3, kind: output, shape index: {}]  }
   0x1   :  { %10 = vsyncpa [#allocation3 + $0x1], 0 }
   0x2   :  { %11 = vsyncpa [#allocation4], 0 }
   0x3   :  { %13 = vsyncpa [#allocation4 + $0x1], 0  ;;  %s729_s12 = smov 0   ;;  %s731_s13 = smov 0  }
   0x4   :  { %s733_s14 = smov 0   ;;  %s735_s15 = smov 0  }
   0x5   :  { %s737_s16 = smov 0   ;;  %s739_s17 = smov 0  }
   0x6 LB: > { %s455_s18 = sadd.s32 4294967295, %s702_s17   ;;  %s456_s19 = sadd.s32 4294967294, %s702_s17   ;;  %s702_s17 = sphi %s739_s17, %s19_s17   ;;  %s698_s16 = sphi %s737_s16, %s942_s16   ;;  %s694_s15 = sphi %s735_s15, %s941_s15   ;;  %s690_s14 = sphi %s733_s14, %s940_s14   ;;  %s686_s13 = sphi %s731_s13, %s939_s13   ;;  %s682_s12 = sphi %s729_s12, %s938_s12  }
   0x7   : > { %s31_s20 = sadd.s32 1, %s698_s16  ;;  %s40_s21 = sadd.s32 1, %s690_s14 }
   0x8   : > { %p33_p0 = scmp.ge.s32.totalorder %s31_s20, 2  ;;  %p47_p1 = scmp.ne.s32.totalorder %s690_s14, %s686_s13 }
   0x9   : > { %p48_p2 = scmp.eq.s32.totalorder %s702_s17, 0  ;;  %p53_p3 = scmp.ne.s32.totalorder %s686_s13, %s682_s12 }
   0xa   : > { %s944_s20 = smov (%p33_p0, %s31_s20), 0  ;;  %p54_p5 = scmp.eq.s32.totalorder %s455_s18, 0 }
   0xb   : > { %p770_p4 = por %p48_p2, %p47_p1  ;;  %s35_s23 = ssub.s32 %s698_s16, %s944_s20 }
   0xc   : > { %p121_p6 = scmp.eq.s32.totalorder %s455_s18, 1  ;;  %p38_p7 = scmp.eq.s32.totalorder %s35_s23, 0 }
   0xd   : > { %p776_p8 = por %p54_p5, %p53_p3  ;;  %p127_p10 = scmp.eq.s32.totalorder %s456_s19, 1 }
   0xe   : > { %p780_p9 = por %p121_p6, %p47_p1  ;;  %p458_p12 = scmp.ge.s32.totalorder %s702_s17, 2 }
   0xf   : > { %s785_s26 = scalar_select %p38_p7, %s690_s14, %s40_s21  }
  0x10   : > { %p787_p11 = por %p127_p10, %p53_p3  ;;  %p532_p13 = scmp.lt.s32.totalorder %s702_s17, 2 }
  0x11   : > { %s153_s28 = sand.u32 1, %s690_s14   ;;  %s470_s30 = sshll.u32 %s698_s16, 7 }
  0x12   : > { %s459_s29 = sshll.u32 %s153_s28, 7  ;;  %s163_s6 = scalar_lea.hbm %s930_s0, %s470_s30 }
  0x13   : > { %s157_s7 = scalar_lea.vmem [#allocation2], %s459_s29  ;;  %s164_s9 = sshll.u32 %s163_s6, 4  ;;  %s165_s9 = int_to_ptr.hbm [resolvable:$true] %s164_s9 }
  0x14   : > { %s166_s8 = sshll.u32 %s157_s7, 4  ;;  %p525_p0 = pnand %p532_p13, %p770_p4  ;;  %s167_s8 = int_to_ptr.vmem [resolvable:$true] %s166_s8 }
  0x15   : > { %p462_p1 = scmp.ge.s32.totalorder %s702_s17, 1  ;;  %s154_s10 = scalar_lea.sflag [#allocation3], %s153_s28 }
  0x16   : > { %s704_s11 = smov 128   ;;  %s705_s18 = smov 8  }
  0x17   : > { %527 = dma.hbm_to_vmem [thread:$0]  (!%p525_p0), %s165_s9, 2048, %s167_s8, %s154_s10, %s704_s11, %s704_s11, %s705_s18  }
  0x18   : > { %p174_p2 = scmp.lt.s32.totalorder %s702_s17, 3 }
  0x1a   : > { %p175_p3 = pnand %p462_p1, %p174_p2 }
  0x1b   : > { %s803_s19 = sand.u32 (!%p175_p3), 1, %s686_s13  }
  0x1c   : > { %178 = sbr.rel (%p175_p3) target bundleno = 220 (0xdc), region = 32  ;;  %s463_s21 = sshll.u32 (!%p175_p3), %s803_s19, 7 }
  0x1d   : > { %s181_s23 = scalar_lea.sflag (!%p175_p3), [#allocation3], %s803_s19  ;;  %s807_s29 = scalar_lea.vmem (!%p175_p3), [#allocation2], %s463_s21 }
  0x21   : > { %673 = dma.done.wait (%p776_p8), %s181_s23, 2048  }
  0x22   : > { %675 = vsyncadd (%p776_p8), %s181_s23, 4294965248  ;;  %v706_v0 = vmov 0   ;;  %v231_v1 = vld [vmem:[%s807_s29 + $0x78] sm:$0xff]  ;;  %v230_v2 = vld [vmem:[%s807_s29 + $0x70] sm:$0xff]  ;;  %s464_s22 = sshll.u32 %s803_s19, 6  ;;  %s471_s28 = sshll.u32 %s694_s15, 6 }
  0x23   : > { %588 = vset.pattern.permute.xlu1 %v706_v0  ;;  %587 = vset.pattern.permute.xlu0 %v706_v0  ;;  %v229_v3 = vld [vmem:[%s807_s29 + $0x68] sm:$0xff]  ;;  %v228_v4 = vld [vmem:[%s807_s29 + $0x60] sm:$0xff]  ;;  %v227_v5 = vld [vmem:[%s807_s29 + $0x58] sm:$0xff]  ;;  %s878_s24 = scalar_lea.vmem [#allocation5], %s464_s22  ;;  %s366_s15 = scalar_lea.hbm %s933_s3, %s471_s28 }
  0x24   : > { %589 = vset.pattern.permute.xlu2 %v706_v0  ;;  %280 = vmatpush.msra.mxu0 %v231_v1  ;;  %v226_v6 = vld [vmem:[%s807_s29 + $0x50] sm:$0xff]  ;;  %v225_v7 = vld [vmem:[%s807_s29 + $0x48] sm:$0xff]  ;;  %v224_v8 = vld [vmem:[%s807_s29 + $0x40] sm:$0xff]  ;;  %s367_s5 = sshll.u32 %s878_s24, 4  ;;  %s369_s6 = sshll.u32 %s366_s15, 4  ;;  %s891_s5 = int_to_ptr.vmem [resolvable:$true] %s367_s5  ;;  %s370_s6 = int_to_ptr.hbm [resolvable:$true] %s369_s6 }
  0x25   : > { %472 = vmatpush.msra.mxu1 %v231_v1  ;;  %473 = vmatpush.msra.mxu2 %v231_v1  ;;  %v223_v9 = vld [vmem:[%s807_s29 + $0x38] sm:$0xff]  ;;  %v222_v10 = vld [vmem:[%s807_s29 + $0x30] sm:$0xff]  ;;  %v221_v11 = vld [vmem:[%s807_s29 + $0x28] sm:$0xff]  ;;  %s354_s7 = scalar_lea.sflag [#allocation4], %s803_s19  ;;  %s634_s8 = sshra.s32 %s370_s6, 4  ;;  %s635_s8 = int_to_ptr.hbm [resolvable:$true] %s634_s8 }
  0x26   : > { %474 = vmatpush.msra.mxu3 %v231_v1  ;;  %281 = vmatpush.msra.mxu0 %v230_v2  ;;  %v220_v12 = vld [vmem:[%s807_s29 + $0x20] sm:$0xff]  ;;  %v234_v13 = vld [vmem:[%s932_s2 + $0x10] sm:$0xff]  ;;  %v219_v15 = vld [vmem:[%s807_s29 + $0x18] sm:$0xff]  ;;  %s636_s9 = scalar_lea.hbm %s635_s8, 64  ;;  %s640_s18 = scalar_lea.hbm %s933_s3, 128 }
  0x27   : > { %475 = vmatpush.msra.mxu1 %v230_v2  ;;  %476 = vmatpush.msra.mxu2 %v230_v2  ;;  %v232_v14 = vld [vmem:[%s932_s2] sm:$0xff]  ;;  %v218_v16 = vld [vmem:[%s807_s29 + $0x10] sm:$0xff]  ;;  %v217_v17 = vld [vmem:[%s807_s29 + $0x8] sm:$0xff]  ;;  %p637_p4 = scmp.ne.s32.totalorder %s635_s8, %s636_s9  ;;  %p641_p7 = scmp.lt.s32.totalorder %s635_s8, %s933_s3 }
  0x28   : > { %477 = vmatpush.msra.mxu3 %v230_v2  ;;  %282 = vmatpush.msra.mxu0 %v229_v3  ;;  %v216_v18 = vld [vmem:[%s807_s29] sm:$0xff]  ;;  %v210_v20 = vld [vmem:[%s931_s1 + $0x10] sm:$0xff]  ;;  %v235_v23 = vld [vmem:[%s932_s2 + $0x18] sm:$0xff]  ;;  %p642_p8 = scmp.lt.s32.totalorder %s640_s18, %s636_s9 }
  0x29   : > { %478 = vmatpush.msra.mxu1 %v229_v3  ;;  %479 = vmatpush.msra.mxu2 %v229_v3  ;;  %v208_v19 = vld [vmem:[%s931_s1] sm:$0xff]  ;;  %v214_v22 = vld [vmem:[%s931_s1 + $0x30] sm:$0xff]  ;;  %v233_v24 = vld [vmem:[%s932_s2 + $0x8] sm:$0xff]  ;;  %p638_p5 = pnand %p637_p4, %p780_p9 }
  0x2a   : > { %480 = vmatpush.msra.mxu3 %v229_v3  ;;  %283 = vmatpush.msra.mxu0 %v228_v4  ;;  %v212_v21 = vld [vmem:[%s931_s1 + $0x20] sm:$0xff]  ;;  %v209_v26 = vld [vmem:[%s931_s1 + $0x8] sm:$0xff]  ;;  %v211_v27 = vld [vmem:[%s931_s1 + $0x18] sm:$0xff]  ;;  %p643_p10 = por %p642_p8, %p641_p7 }
  0x2b   : > { %481 = vmatpush.msra.mxu1 %v228_v4  ;;  %482 = vmatpush.msra.mxu2 %v228_v4  ;;  %v236_v25 = vld [vmem:[%s932_s2 + $0x20] sm:$0xff]  ;;  %v213_v28 = vld [vmem:[%s931_s1 + $0x28] sm:$0xff]  ;;  %v215_v29 = vld [vmem:[%s931_s1 + $0x38] sm:$0xff]  ;;  %p639_p6 = pneg %p638_p5 }
  0x2c   : > { %483 = vmatpush.msra.mxu3 %v228_v4  ;;  %284 = vmatpush.msra.mxu0 %v227_v5  ;;  %v239_v30 = vld [vmem:[%s932_s2 + $0x38] sm:$0xff]  ;;  %v238_v31 = vld [vmem:[%s932_s2 + $0x30] sm:$0xff]  ;;  %v237_v32 = vld [vmem:[%s932_s2 + $0x28] sm:$0xff] }
  0x2d   : > { %484 = vmatpush.msra.mxu1 %v227_v5  ;;  %485 = vmatpush.msra.mxu2 %v227_v5  ;;  %p644_p13 = pnand %p643_p10, %p639_p6 }
  0x2e   : > { %486 = vmatpush.msra.mxu3 %v227_v5  ;;  %285 = vmatpush.msra.mxu0 %v226_v6 }
  0x2f   : > { %487 = vmatpush.msra.mxu1 %v226_v6  ;;  %488 = vmatpush.msra.mxu2 %v226_v6 }
  0x30   : > { %489 = vmatpush.msra.mxu3 %v226_v6  ;;  %286 = vmatpush.msra.mxu0 %v225_v7 }
  0x31   : > { %490 = vmatpush.msra.mxu1 %v225_v7  ;;  %491 = vmatpush.msra.mxu2 %v225_v7 }
  0x32   : > { %492 = vmatpush.msra.mxu3 %v225_v7  ;;  %287 = vmatpush.msra.mxu0 %v224_v8 }
  0x33   : > { %493 = vmatpush.msra.mxu1 %v224_v8  ;;  %494 = vmatpush.msra.mxu2 %v224_v8 }
  0x34   : > { %495 = vmatpush.msra.mxu3 %v224_v8  ;;  %288 = vmatpush.msra.mxu0 %v223_v9 }
  0x35   : > { %496 = vmatpush.msra.mxu1 %v223_v9  ;;  %497 = vmatpush.msra.mxu2 %v223_v9 }
  0x36   : > { %498 = vmatpush.msra.mxu3 %v223_v9  ;;  %289 = vmatpush.msra.mxu0 %v222_v10 }
  0x37   : > { %499 = vmatpush.msra.mxu1 %v222_v10  ;;  %500 = vmatpush.msra.mxu2 %v222_v10 }
  0x38   : > { %501 = vmatpush.msra.mxu3 %v222_v10  ;;  %290 = vmatpush.msra.mxu0 %v221_v11 }
  0x39   : > { %502 = vmatpush.msra.mxu1 %v221_v11  ;;  %503 = vmatpush.msra.mxu2 %v221_v11 }
  0x3a   : > { %504 = vmatpush.msra.mxu3 %v221_v11  ;;  %291 = vmatpush.msra.mxu0 %v220_v12 }
  0x3b   : > { %505 = vmatpush.msra.mxu1 %v220_v12  ;;  %506 = vmatpush.msra.mxu2 %v220_v12 }
  0x3c   : > { %507 = vmatpush.msra.mxu3 %v220_v12  ;;  %252 = vperm.xlu1 %588, %v234_v13  }
  0x3d   : > { %242 = vperm.xlu0 %587, %v232_v14   ;;  %292 = vmatpush.msra.mxu0 %v219_v15 }
  0x3e   : > { %508 = vmatpush.msra.mxu1 %v219_v15  ;;  %509 = vmatpush.msra.mxu2 %v219_v15 }
  0x3f   : > { %510 = vmatpush.msra.mxu3 %v219_v15  ;;  %293 = vmatpush.msra.mxu0 %v218_v16 }
  0x40   : > { %511 = vmatpush.msra.mxu1 %v218_v16  ;;  %512 = vmatpush.msra.mxu2 %v218_v16 }
  0x41   : > { %513 = vmatpush.msra.mxu3 %v218_v16  ;;  %294 = vmatpush.msra.mxu0 %v217_v17 }
  0x42   : > { %514 = vmatpush.msra.mxu1 %v217_v17  ;;  %515 = vmatpush.msra.mxu2 %v217_v17 }
  0x43   : > { %516 = vmatpush.msra.mxu3 %v217_v17  ;;  %295 = vmatpush.msra.mxu0 %v216_v18 }
  0x44   : > { %517 = vmatpush.msra.mxu1 %v216_v18  ;;  %518 = vmatpush.msra.mxu2 %v216_v18 }
  0x45   : > { %519 = vmatpush.msra.mxu3 %v216_v18  ;;  %296 = vmatmul.f32.vlgmr.msra.gmra.mxu0 %v208_v19 }
  0x46   : > { %302 = vmatmul.f32.vlgmr.msra.gmra.mxu1 %v210_v20  ;;  %308 = vmatmul.f32.vlgmr.msra.gmra.mxu2 %v212_v21 }
  0x47   : > { %314 = vmatmul.f32.vlgmr.msra.gmra.mxu3 %v214_v22  ;;  %257 = vperm.xlu1 %588, %v235_v23  }
  0x48   : > { %247 = vperm.xlu0 %587, %v233_v24   ;;  %262 = vperm.xlu2 %589, %v236_v25  }
  0x4d   : > { %299 = vmatmul.f32.gmra.mxu0 %v209_v26 }
  0x4e   : > { %305 = vmatmul.f32.gmra.mxu1 %v211_v27  ;;  %311 = vmatmul.f32.gmra.mxu2 %v213_v28 }
  0x4f   : > { %317 = vmatmul.f32.gmra.mxu3 %v215_v29  ;;  %277 = vperm.xlu1 %588, %v239_v30  }
  0x50   : > { %272 = vperm.xlu0 %587, %v238_v31   ;;  %267 = vperm.xlu2 %589, %v237_v32  }
  0xa2   : > { %v263_v43 = vpop.permute.xlu2 %262 }
  0xaa   : > { %v268_v0 = vpop.permute.xlu2 %267 }
  0xae   : > { %v253_v34 = vpop.permute.xlu1 %252 }
  0xaf   : > { %v243_v33 = vpop.permute.xlu0 %242 }
  0xb9   : > { %v258_v42 = vpop.permute.xlu1 %257 }
  0xba   : > { %v248_v35 = vpop.permute.xlu0 %247 }
  0xc1   : > { %v278_v63 = vpop.permute.xlu1 %277 }
  0xc2   : > { %v297_v36 = vpop.f32.mrf.mxu0  ;;  %v273_v46 = vpop.permute.xlu0 %272 }
  0xc3   : > { %v303_v37 = vpop.f32.mrf.mxu1  ;;  %v298_v38 = vadd.f32 %v297_v36, %v243_v33 }
  0xc4   : > { %v304_v39 = vadd.f32 %v303_v37, %v253_v34 }
  0xc5   : > { %vm321_vm0 = vcmp.gt.f32.partialorder %v298_v38, 0.0  ;;  %v329_v40 = vmul.f32 0.6850005, %v298_v38 }
  0xc6   : > { %vm323_vm1 = vcmp.gt.f32.partialorder %v304_v39, 0.0  ;;  %v331_v41 = vmul.f32 0.6850005, %v304_v39 }
  0xc7   : > { %v337_v44 = vsel %vm321_vm0, %v298_v38, %v329_v40 }
  0xc8   : > { %v339_v45 = vsel %vm323_vm1, %v304_v39, %v331_v41  ;;  %345 = vst [vmem:[%s878_s24] sm:$0xff] %v337_v44 }
  0xc9   : > { %347 = vst [vmem:[%s878_s24 + $0x10] sm:$0xff] %v339_v45  ;;  %v309_v47 = vpop.f32.mrf.mxu2 }
  0xca   : > { %v315_v48 = vpop.f32.mrf.mxu3  ;;  %v310_v49 = vadd.f32 %v309_v47, %v263_v43  ;;  %v300_v51 = vpop.f32.mrf.mxu0 }
  0xcb   : > { %v316_v50 = vadd.f32 %v315_v48, %v273_v46  ;;  %v306_v52 = vpop.f32.mrf.mxu1  ;;  %v301_v53 = vadd.f32 %v300_v51, %v248_v35 }
  0xcc   : > { %v307_v54 = vadd.f32 %v306_v52, %v258_v42  ;;  %vm325_vm2 = vcmp.gt.f32.partialorder %v310_v49, 0.0  ;;  %v333_v55 = vmul.f32 0.6850005, %v310_v49 }
  0xcd   : > { %vm327_vm3 = vcmp.gt.f32.partialorder %v316_v50, 0.0  ;;  %v335_v56 = vmul.f32 0.6850005, %v316_v50  ;;  %vm322_vm4 = vcmp.gt.f32.partialorder %v301_v53, 0.0  ;;  %v330_v57 = vmul.f32 0.6850005, %v301_v53 }
  0xce   : > { %vm324_vm5 = vcmp.gt.f32.partialorder %v307_v54, 0.0  ;;  %v332_v58 = vmul.f32 0.6850005, %v307_v54  ;;  %v341_v59 = vsel %vm325_vm2, %v310_v49, %v333_v55 }
  0xcf   : > { %v343_v60 = vsel %vm327_vm3, %v316_v50, %v335_v56  ;;  %349 = vst [vmem:[%s878_s24 + $0x20] sm:$0xff] %v341_v59  ;;  %v338_v61 = vsel %vm322_vm4, %v301_v53, %v330_v57 }
  0xd0   : > { %v340_v62 = vsel %vm324_vm5, %v307_v54, %v332_v58  ;;  %351 = vst [vmem:[%s878_s24 + $0x30] sm:$0xff] %v343_v60 }
  0xd1   : > { %346 = vst [vmem:[%s878_s24 + $0x8] sm:$0xff] %v338_v61  ;;  %v312_v1 = vpop.f32.mrf.mxu2 }
  0xd2   : > { %v318_v2 = vpop.f32.mrf.mxu3  ;;  %348 = vst [vmem:[%s878_s24 + $0x18] sm:$0xff] %v340_v62  ;;  %v313_v3 = vadd.f32 %v312_v1, %v268_v0 }
  0xd3   : > { %v319_v4 = vadd.f32 %v318_v2, %v278_v63 }
  0xd4   : > { %vm326_vm6 = vcmp.gt.f32.partialorder %v313_v3, 0.0  ;;  %v334_v5 = vmul.f32 0.6850005, %v313_v3 }
  0xd5   : > { %vm328_vm7 = vcmp.gt.f32.partialorder %v319_v4, 0.0  ;;  %v336_v6 = vmul.f32 0.6850005, %v319_v4 }
  0xd6   : > { %v342_v7 = vsel %vm326_vm6, %v313_v3, %v334_v5 }
  0xd7   : > { %v344_v8 = vsel %vm328_vm7, %v319_v4, %v336_v6  ;;  %350 = vst [vmem:[%s878_s24 + $0x28] sm:$0xff] %v342_v7 }
  0xd8   : > { %352 = vst [vmem:[%s878_s24 + $0x38] sm:$0xff] %v344_v8 }
  0xd9   : > { %647 = shalt.err (!%p644_p13)
}
  0xda   : > { %s707_s19 = smov 128   ;;  %s708_s29 = smov 8  }
  0xdb   : > { %522 = dma.vmem_to_hbm [thread:$0]  (%p780_p9), %s891_s5, 1024, %s370_s6, %s354_s7, %s707_s19, %s707_s19, %s708_s29  }
  0xdc PF: > { %s384_s22 = sand.u32 1, %s682_s12   ;;  %p529_p0 = pnand %p458_p12, %p787_p11 }
  0xdd   : > { %s385_s24 = scalar_lea.sflag [#allocation4], %s384_s22 }
  0xde   : > { %p530_p1 = pneg %p529_p0 }
  0xe0   : > { %677 = dma.done.wait (%p530_p1), %s385_s24, 1024  }
  0xe1   : > { %679 = vsyncadd (%p530_p1), %s385_s24, 4294966272  ;;  %s19_s17 = sadd.s32 1, %s702_s17   ;;  %s938_s12 = smov %s686_s13 }
  0xe2   : > { %p16_p2 = scmp.ge.s32.totalorder %s19_s17, 4   ;;  %s939_s13 = smov %s690_s14 }
  0xe3   : > { %s940_s14 = smov %s785_s26  ;;  %s941_s15 = smov %s698_s16 }
  0xe4   : > { %s942_s16 = smov %s944_s20  ;;  %18 = sbr.rel (!%p16_p2) target bundleno = 6 (0x6), region = 77 }
  0xe9   :  { %391 = vsyncpa [#allocation3], 1 }
  0xea   :  { %393 = vsyncpa [#allocation3 + $0x1], 1 }
  0xeb   :  { %394 = vsyncpa [#allocation4], 1 }
  0xec   :  { %396 = vsyncpa [#allocation4 + $0x1], 1 }

</bundles_post_ra>
